<compile_context>
chip_gen: v7x
topology: tpu7x:2x2x1
jax: 0.10.0
libtpu: 0.0.40
codegen_flags: <defaults>
</compile_context>

<pallas_src>
from functools import partial

import jax
import jax.numpy as jnp
from jax import lax
from jax.experimental import pallas as pl
from jax.experimental.pallas import tpu as pltpu

_LANE = 128
_F32 = 4


# ---------------------------------------------------------------------------
# Kernel 1: full class row resident per batch tile (moderate C).
# ---------------------------------------------------------------------------
def _ce_argmax_row_kernel(logits_ref, labels_ref, loss_ref, idx_ref):
    x = logits_ref[...]                                 # (TB, C) native dtype
    labels = labels_ref[...]                            # (TB, 1) int32
    tb, c = x.shape

    xf = x.astype(jnp.float32)                          # in-kernel cast (VPU)
    col = lax.broadcasted_iota(jnp.int32, (tb, c), 1)

    # Numerically stable log-sum-exp, per row (classes on the lane axis).
    row_max = jnp.max(xf, axis=1, keepdims=True)        # (TB, 1)
    shifted = xf - row_max                              # (TB, C)
    sum_exp = jnp.sum(jnp.exp(shifted), axis=1)         # (TB,)   exp -> EUP

    # Gather logits[i, label[i]] via one-hot select in the shifted domain so
    # row_max cancels: loss = log(sum_exp) - (x[label] - row_max).
    picked = jnp.sum(jnp.where(col == labels, shifted, 0.0), axis=1)
    per_row_loss = jnp.log(sum_exp) - picked            # (TB,)

    # argmax along dim=1: first index achieving the row max.
    idx = jnp.min(jnp.where(xf == row_max, col, jnp.int32(c)), axis=1)

    # Lane-dense (1, TB) row stores.
    loss_ref[...] = per_row_loss.reshape(1, tb)
    idx_ref[...] = idx.reshape(1, tb).astype(jnp.int32)


# ---------------------------------------------------------------------------
# Kernel 2: class-tiled online LSE + running argmax (large C, v7x-safe VMEM).
# ---------------------------------------------------------------------------
def _make_ce_argmax_tiled_kernel(c_total, ragged_c):
    def kernel(logits_ref, labels_ref, loss_ref, idx_ref,
               m_ref, l_ref, p_ref, bv_ref, bi_ref):
        kc = pl.program_id(1)
        nkc = pl.num_programs(1)

        @pl.when(kc == 0)
        def _():
            m_ref[...] = jnp.full_like(m_ref, -jnp.inf)
            l_ref[...] = jnp.zeros_like(l_ref)
            p_ref[...] = jnp.zeros_like(p_ref)
            bv_ref[...] = jnp.full_like(bv_ref, -jnp.inf)
            bi_ref[...] = jnp.zeros_like(bi_ref)

        x = logits_ref[...].astype(jnp.float32)          # (TB, TC)
        labels = labels_ref[...]                         # (TB, 1) int32
        tb, tc = x.shape

        local_col = lax.broadcasted_iota(jnp.int32, (tb, tc), 1)
        col = local_col + kc * tc                        # global class index

        if ragged_c:
            # Mask out-of-range class columns in the ragged last class tile.
            limit = c_total - kc * tc
            x = jnp.where(local_col < limit, x, -jnp.inf)

        # --- online log-sum-exp -------------------------------------------
        blk_max = jnp.max(x, axis=1, keepdims=True)      # (TB, 1)
        m_new = jnp.maximum(m_ref[...], blk_max)
        alpha = jnp.exp(m_ref[...] - m_new)
        l_ref[...] = alpha * l_ref[...] + jnp.sum(
            jnp.exp(x - m_new), axis=1, keepdims=True)
        m_ref[...] = m_new

        # --- gather logits[i, label[i]] (label hits exactly one tile) ------
        p_ref[...] += jnp.sum(jnp.where(col == labels, x, 0.0),
                              axis=1, keepdims=True)

        # --- running argmax (strict > keeps the first-occurrence index) ----
        blk_idx = jnp.min(jnp.where(x == blk_max, col, jnp.int32(c_total)),
                          axis=1, keepdims=True)
        better = blk_max > bv_ref[...]
        bi_ref[...] = jnp.where(better, blk_idx, bi_ref[...])
        bv_ref[...] = jnp.where(better, blk_max, bv_ref[...])

        @pl.when(kc == nkc - 1)
        def _():
            loss_ref[...] = jnp.log(l_ref[...]) + m_ref[...] - p_ref[...]
            idx_ref[...] = bi_ref[...]

    return kernel


# ---------------------------------------------------------------------------
# Tiling policy helpers
# ---------------------------------------------------------------------------
def _round_up(x, m):
    return ((x + m - 1) // m) * m


def _vmem_capacity_bytes():
    """Per-core VMEM capacity (128 MiB v5e/v6e, 64 MiB v7x); safe fallback."""
    try:
        cap = getattr(pltpu.get_tpu_info(), "vmem_capacity_bytes", None)
        if cap:
            return int(cap)
    except Exception:
        pass
    return 64 * 1024 * 1024  # conservative (v7x-sized) default


def _per_row_bytes(cols, itemsize, extra=0):
    # 2x double-buffered native input tile + ~4 f32 compiler temporaries
    # (cast / iota / exp / select) + lane-padded (tb,1)->(tb,128) labels x2.
    return 2 * cols * itemsize + 4 * cols * _F32 + 2 * _LANE * _F32 + extra


def _choose_tb(b, cols, itemsize, budget, extra_per_row=0):
    """Batch-tile rows: fill the VMEM budget, keep >= ~8 grid tiles on large
    batches (megacore), never drop below 512 rows unless the batch is
    smaller, never exceed the batch."""
    per_row = _per_row_bytes(cols, itemsize, extra_per_row)
    tb = max(budget // per_row, 1)
    tb = (tb // _LANE) * _LANE
    target = _round_up(pl.cdiv(b, 8), _LANE)
    tb = min(tb, max(target, 512))
    tb = max(tb, _LANE)
    if tb >= b:
        return int(b)       # single tile: block == full batch, no padding
    return int(tb)


def _sanitize_forced_tb(tb, b):
    tb = int(tb)
    if tb >= b:
        return int(b)
    return max(_LANE, (tb // _LANE) * _LANE)


# ---------------------------------------------------------------------------
# Public wrapper
# ---------------------------------------------------------------------------
@partial(jax.jit, static_argnames=("tb", "tc"))
def classifier_forward(logits, labels, tb=None, tc=None):
    """logits: [B, C] (f32/bf16), labels: [B] int -> (scalar loss, [B] argmax)."""
    b, c = logits.shape
    itemsize = jnp.dtype(logits.dtype).itemsize

    # Generation-aware VMEM budget: ~48 MiB on v7x, ~96 MiB on v5e/v6e.
    cap = _vmem_capacity_bytes()
    vmem_limit = min(cap * 3 // 4, 96 * 1024 * 1024)
    budget = max(vmem_limit - (8 << 20), 16 << 20)

    per_row_full = _per_row_bytes(c, itemsize)
    use_tiled = (tc is not None) or (per_row_full * 256 > budget)
    if use_tiled:
        tc = 2048 if tc is None else int(tc)
        tc = max(_LANE, (tc // _LANE) * _LANE)
        if tc >= c:
            use_tiled = False   # whole class row fits in one tile

    labels2d = labels.reshape(b, 1).astype(jnp.int32)

    if not use_tiled:
        # ------------------- full-class-row kernel -------------------------
        if tb is None:
            tb = _choose_tb(b, c, itemsize, budget)
        else:
            tb = _sanitize_forced_tb(tb, b)
        nt = pl.cdiv(b, tb)
        bp = nt * tb
        if bp != b:
            # Only the tiny labels vector is padded; logits are NOT copied —
            # the ragged last batch tile uses Pallas' bounds-clamped DMA and
            # its garbage rows are sliced off before the mean.
            labels2d = jnp.pad(labels2d, ((0, bp - b), (0, 0)))

        cost = pl.CostEstimate(
            flops=6 * b * c,
            transcendentals=b * c + b,
            bytes_accessed=b * c * itemsize + b * 4 + b * 8,
        )

        per_row_loss, idx = pl.pallas_call(
            _ce_argmax_row_kernel,
            out_shape=(
                jax.ShapeDtypeStruct((1, bp), jnp.float32),
                jax.ShapeDtypeStruct((1, bp), jnp.int32),
            ),
            grid=(nt,),
            in_specs=[
                pl.BlockSpec((tb, c), lambda i: (i, 0)),   # logits batch tile
                pl.BlockSpec((tb, 1), lambda i: (i, 0)),   # labels batch tile
            ],
            out_specs=(
                pl.BlockSpec((1, tb), lambda i: (0, i)),   # loss (lane-dense)
                pl.BlockSpec((1, tb), lambda i: (0, i)),   # argmax (lane-dense)
            ),
            compiler_params=pltpu.CompilerParams(
                dimension_semantics=("parallel",),
                vmem_limit_bytes=int(vmem_limit),
            ),
            cost_estimate=cost,
        )(logits, labels2d)

        loss = jnp.sum(per_row_loss[0, :b]) / jnp.float32(b)
        output = idx[0, :b]
        return loss, output

    # ------------------- class-tiled online-LSE kernel ----------------------
    nkc = pl.cdiv(c, tc)
    ragged_c = (c % tc) != 0

    if tb is None:
        tb = _choose_tb(b, tc, itemsize, budget,
                        extra_per_row=5 * _LANE * _F32)   # f32/i32 scratch rows
    else:
        tb = _sanitize_forced_tb(tb, b)
    nt = pl.cdiv(b, tb)
    bp = nt * tb
    if bp != b:
        labels2d = jnp.pad(labels2d, ((0, bp - b), (0, 0)))

    kernel = _make_ce_argmax_tiled_kernel(c, ragged_c)

    cost = pl.CostEstimate(
        flops=8 * b * c,
        transcendentals=b * c + b * nkc,
        bytes_accessed=b * c * itemsize + b * 4 * nkc + b * 8,
    )

    per_row_loss, idx = pl.pallas_call(
        kernel,
        out_shape=(
            jax.ShapeDtypeStruct((bp, 1), jnp.float32),
            jax.ShapeDtypeStruct((bp, 1), jnp.int32),
        ),
        grid=(nt, nkc),
        in_specs=[
            pl.BlockSpec((tb, tc), lambda i, k: (i, k)),   # logits (batch, class)
            pl.BlockSpec((tb, 1), lambda i, k: (i, 0)),    # labels batch tile
        ],
        out_specs=(
            pl.BlockSpec((tb, 1), lambda i, k: (i, 0)),    # per-row loss
            pl.BlockSpec((tb, 1), lambda i, k: (i, 0)),    # argmax indices
        ),
        scratch_shapes=[
            pltpu.VMEM((tb, 1), jnp.float32),   # running max  m
            pltpu.VMEM((tb, 1), jnp.float32),   # running sum-exp l
            pltpu.VMEM((tb, 1), jnp.float32),   # picked logit
            pltpu.VMEM((tb, 1), jnp.float32),   # best value
            pltpu.VMEM((tb, 1), jnp.int32),     # best index
        ],
        compiler_params=pltpu.CompilerParams(
            dimension_semantics=("parallel", "arbitrary"),
            vmem_limit_bytes=int(vmem_limit),
        ),
        cost_estimate=cost,
    )(logits, labels2d)

    loss = jnp.sum(per_row_loss[:b, 0]) / jnp.float32(b)
    output = idx[:b, 0]
    return loss, output


# ---------------------------------------------------------------------------
# Reference + tests
# ---------------------------------------------------------------------------
def _reference(logits, labels):
    lf = logits.astype(jnp.float32)
    b = lf.shape[0]
    ref_loss = jnp.mean(jax.nn.logsumexp(lf, axis=1) - lf[jnp.arange(b), labels])
    ref_out = jnp.argmax(lf, axis=1).astype(jnp.int32)
    return ref_loss, ref_out


if __name__ == "__main__":
    key = jax.random.PRNGKey(0)
    k1, k2, k3, k4, k5, k6, k7, k8 = jax.random.split(key, 8)

    # --- 1. Small case matching the module's head: [B, C] logits, [B] labels
    B, C = 8, 16
    logits = jax.random.normal(k1, (B, C), dtype=jnp.float32)
    labels = jax.random.randint(k2, (B,), 0, C, dtype=jnp.int32)
    loss, output = classifier_forward(logits, labels)
    jax.block_until_ready((loss, output))
    ref_loss, ref_out = _reference(logits, labels)
    assert jnp.allclose(loss, ref_loss, atol=1e-5, rtol=1e-5), (loss, ref_loss)
    assert jnp.array_equal(output, ref_out), (output, ref_out)

    # --- 2. Multi-tile batch with a ragged last tile (no logits padding) ----
    B2, C2 = 300, 40
    logits2 = jax.random.normal(k3, (B2, C2), dtype=jnp.float32)
    labels2 = jax.random.randint(k4, (B2,), 0, C2, dtype=jnp.int32)
    loss2, output2 = classifier_forward(logits2, labels2, tb=128)
    jax.block_until_ready((loss2, output2))
    ref_loss2, ref_out2 = _reference(logits2, labels2)
    assert jnp.allclose(loss2, ref_loss2, atol=1e-5, rtol=1e-5), (loss2, ref_loss2)
    assert jnp.array_equal(output2, ref_out2), (output2, ref_out2)

    # --- 3. bf16 logits: streamed as bf16, cast to f32 inside the kernel ----
    logits_bf16 = logits.astype(jnp.bfloat16)
    loss3, output3 = classifier_forward(logits_bf16, labels)
    jax.block_until_ready((loss3, output3))
    ref_loss3, ref_out3 = _reference(logits_bf16, labels)
    assert jnp.allclose(loss3, ref_loss3, atol=1e-3, rtol=1e-3), (loss3, ref_loss3)
    assert jnp.array_equal(output3, ref_out3), (output3, ref_out3)

    # --- 4. Class-tiled path: ragged class tiles, single batch tile ---------
    B4, C4 = 72, 200
    logits4 = jax.random.normal(k5, (B4, C4), dtype=jnp.float32)
    labels4 = jax.random.randint(k6, (B4,), 0, C4, dtype=jnp.int32)
    loss4, output4 = classifier_forward(logits4, labels4, tc=128)
    jax.block_until_ready((loss4, output4))
    ref_loss4, ref_out4 = _reference(logits4, labels4)
    assert jnp.allclose(loss4, ref_loss4, atol=1e-4, rtol=1e-4), (loss4, ref_loss4)
    assert jnp.array_equal(output4, ref_out4), (output4, ref_out4)

    # --- 5. Class-tiled path: multi batch tiles x multi class tiles ---------
    B5, C5 = 300, 256
    logits5 = jax.random.normal(k7, (B5, C5), dtype=jnp.float32)
    labels5 = jax.random.randint(k8, (B5,), 0, C5, dtype=jnp.int32)
    loss5, output5 = classifier_forward(logits5, labels5, tb=128, tc=128)
    jax.block_until_ready((loss5, output5))
    ref_loss5, ref_out5 = _reference(logits5, labels5)
    assert jnp.allclose(loss5, ref_loss5, atol=1e-4, rtol=1e-4), (loss5, ref_loss5)
    assert jnp.array_equal(output5, ref_out5), (output5, ref_out5)

    print("KERNEL_OK")
</pallas_src>

<mosaic_0001>
module attributes {stable_mosaic.version = 11 : i64} {
  func.func @_ce_argmax_row_kernel(%arg0: i32, %arg1: memref<8x16xf32, #tpu.memory_space<vmem>>, %arg2: memref<8x1xi32, #tpu.memory_space<vmem>>, %arg3: memref<1x8xf32, #tpu.memory_space<vmem>>, %arg4: memref<1x8xi32, #tpu.memory_space<vmem>>) attributes {dimension_semantics = [#tpu.dimension_semantics<parallel>], iteration_bounds = array<i64: 1>, scalar_prefetch = 0 : i64, scratch_operands = 0 : i64, tpu.core_type = #tpu.core_type<tc>, window_params = [{transform_indices = @transform_0, window_bounds = array<i64: 8, 16>}, {transform_indices = @transform_1, window_bounds = array<i64: 8, 1>}, {transform_indices = @transform_2, window_bounds = array<i64: 1, 8>}, {transform_indices = @transform_3, window_bounds = array<i64: 1, 8>}]} {
    %c0 = arith.constant 0 : index
    %c0_0 = arith.constant 0 : index
    %0 = vector.load %arg1[%c0, %c0_0] : memref<8x16xf32, #tpu.memory_space<vmem>>, vector<8x16xf32>
    %c0_1 = arith.constant 0 : index
    %c0_2 = arith.constant 0 : index
    %1 = vector.load %arg2[%c0_1, %c0_2] : memref<8x1xi32, #tpu.memory_space<vmem>>, vector<8x1xi32>
    %2 = tpu.iota {dimensions = array<i32: 1>} : vector<8x16xi32>
    %cst = arith.constant dense<0xFF800000> : vector<8xf32>
    %3 = vector.multi_reduction <maximumf>, %0, %cst [1] : vector<8x16xf32> to vector<8xf32>
    %4 = vector.shape_cast %3 : vector<8xf32> to vector<8x1xf32>
    %5 = vector.broadcast %4 : vector<8x1xf32> to vector<8x16xf32>
    %6 = arith.subf %0, %5 : vector<8x16xf32>
    %7 = math.exp %6 : vector<8x16xf32>
    %cst_3 = arith.constant dense<0.000000e+00> : vector<8xf32>
    %8 = vector.multi_reduction <add>, %7, %cst_3 [1] : vector<8x16xf32> to vector<8xf32>
    %9 = vector.broadcast %1 : vector<8x1xi32> to vector<8x16xi32>
    %10 = arith.cmpi eq, %2, %9 : vector<8x16xi32>
    %cst_4 = arith.constant 0.000000e+00 : f32
    %11 = vector.broadcast %cst_4 : f32 to vector<8x16xf32>
    %12 = arith.select %10, %6, %11 : vector<8x16xi1>, vector<8x16xf32>
    %cst_5 = arith.constant dense<0.000000e+00> : vector<8xf32>
    %13 = vector.multi_reduction <add>, %12, %cst_5 [1] : vector<8x16xf32> to vector<8xf32>
    %14 = math.log %8 : vector<8xf32>
    %15 = arith.subf %14, %13 : vector<8xf32>
    %16 = vector.broadcast %4 : vector<8x1xf32> to vector<8x16xf32>
    %17 = arith.cmpf oeq, %0, %16 : vector<8x16xf32>
    %c16_i32 = arith.constant 16 : i32
    %18 = vector.broadcast %c16_i32 : i32 to vector<8x16xi32>
    %19 = arith.select %17, %2, %18 : vector<8x16xi1>, vector<8x16xi32>
    %cst_6 = arith.constant dense<2147483647> : vector<8xi32>
    %20 = vector.multi_reduction <minsi>, %19, %cst_6 [1] : vector<8x16xi32> to vector<8xi32>
    %21 = vector.shape_cast %15 : vector<8xf32> to vector<1x8xf32>
    %c0_7 = arith.constant 0 : index
    %c0_8 = arith.constant 0 : index
    %22 = vector.load %arg3[%c0_7, %c0_8] : memref<1x8xf32, #tpu.memory_space<vmem>>, vector<1x8xf32>
    tpu.vector_store %arg3[%c0_7, %c0_8], %21 {strides = array<i32>} : memref<1x8xf32, #tpu.memory_space<vmem>>, vector<1x8xf32>,
    %23 = vector.shape_cast %20 : vector<8xi32> to vector<1x8xi32>
    %c0_9 = arith.constant 0 : index
    %c0_10 = arith.constant 0 : index
    %24 = vector.load %arg4[%c0_9, %c0_10] : memref<1x8xi32, #tpu.memory_space<vmem>>, vector<1x8xi32>
    tpu.vector_store %arg4[%c0_9, %c0_10], %23 {strides = array<i32>} : memref<1x8xi32, #tpu.memory_space<vmem>>, vector<1x8xi32>,
    return
  }
  func.func @transform_0(%arg0: i32) -> (i32, i32) {
    %c0_i32 = arith.constant 0 : i32
    %c0_i32_0 = arith.constant 0 : i32
    return %arg0, %c0_i32 : i32, i32
  }
  func.func @transform_1(%arg0: i32) -> (i32, i32) {
    %c0_i32 = arith.constant 0 : i32
    %c0_i32_0 = arith.constant 0 : i32
    return %arg0, %c0_i32 : i32, i32
  }
  func.func @transform_2(%arg0: i32) -> (i32, i32) {
    %c0_i32 = arith.constant 0 : i32
    %c0_i32_0 = arith.constant 0 : i32
    return %c0_i32, %arg0 : i32, i32
  }
  func.func @transform_3(%arg0: i32) -> (i32, i32) {
    %c0_i32 = arith.constant 0 : i32
    %c0_i32_0 = arith.constant 0 : i32
    return %c0_i32, %arg0 : i32, i32
  }
}

</mosaic_0001>

<bundles_post_ra>
// kernel: classifier_forward.1
= control target key start
LH: loop header
LB: loop body
LE: loop exit
PB: predicated region body
PF: predicated region fallthrough
CT: control target
= control target key end

     0   :  { %vm18_vm0 = vcmask 130048   ;;  %s168_s0 = inlined_call_operand.vmem [shape: f32[8,16], index: 0, kind: input, shape index: {}]   ;;  %s169_s1 = inlined_call_operand.vmem [shape: s32[8,1], index: 1, kind: input, shape index: {}]   ;;  %s170_s2 = inlined_call_operand.vmem [shape: f32[1,8], index: 2, kind: output, shape index: {0}]   ;;  %s171_s3 = inlined_call_operand.hbm [shape: s32[1,8], index: 3, kind: output, shape index: {1}]  }
   0x1   :  { %v14_v0 = vld [vmem:[%s168_s0] sm:$0xff] }
   0x2   :  { %v15_v1 = vld [vmem:[%s169_s1] sm:$0xff] }
   0x3   :  { %9 = vsyncpa [#allocation3], 0  ;;  %v19_v2 = vsel %vm18_vm0, %v14_v0, -inf  ;;  %v119_v3 = vmov 0   ;;  %v16_v4 = vlaneseq  ;;  %s120_s0 = smov [#allocation2]   ;;  %vm62_vm4 = vcmask 57344  }
   0x4   :  { %89 = vset.pattern.permute.xlu1 %v119_v3  ;;  %90 = vset.pattern.permute.xlu0 %v119_v3  ;;  %s77_s1 = sshll.u32 %s120_s0, 4  ;;  %s78_s1 = int_to_ptr.vmem [resolvable:$true] %s77_s1 }
   0x5   :  { %20 = vmax.xlane.f32.xlu0 %v19_v2  ;;  %29 = vperm.xlu1 %89, %v15_v1   ;;  %v17_v5 = vand.u32 127, %v16_v4  ;;  %v58_v24 = vshrl.u32 %v16_v4, 7  ;;  %s95_s16 = scalar_lea.vmem %s78_s1, 16  ;;  %s99_s17 = scalar_lea.vmem %s78_s1, 32 }
   0x6   :  { %p96_p0 = scmp.ne.s32.totalorder %s78_s1, %s95_s16  ;;  %p100_p1 = scmp.lt.s32.totalorder %s78_s1, %s78_s1 }
   0x7   :  { %v59_v29 = vsub.s32 %v17_v5, %v58_v24  ;;  %p101_p2 = scmp.lt.s32.totalorder %s99_s17, %s95_s16 }
   0x9   :  { %p102_p3 = por %p101_p2, %p100_p1 }
   0xb   :  { %p103_p4 = pnand %p102_p3, %p96_p0 }
  0x84   :  { %v30_v16 = vpop.permute.xlu1 %29 }
  0x85   :  { %vm31_vm2 = vcmp.eq.s32.totalorder %v17_v5, %v30_v16 }
  0x92   :  { %v21_v6 = vpop.xlane.xlu0 %20 }
  0x93   :  { %v22_v7 = vsub.f32 %v14_v0, %v21_v6  ;;  %vm39_vm1 = vcmp.eq.f32.partialorder %v14_v0, %v21_v6 }
  0x94   :  { %v40_v8 = vsel %vm39_vm1, %v17_v5, 16 }
  0x95   :  { %v23_v9 = vmul.f32 1.442695, %v22_v7  ;;  %v41_v10 = vsel %vm18_vm0, %v40_v8, 2147483647  ;;  %v32_v20 = vsel %vm31_vm2, %v22_v7, 0.0 }
  0x96   :  { %v43_v11 = vshra.s32 %v41_v10, 16  ;;  %v42_v15 = vand.u32 65535, %v41_v10  ;;  %v33_v21 = vsel %vm18_vm0, %v32_v20, 0.0 }
  0x97   :  { %91 = vpow2.f32 %v23_v9 }
  0x98   :  { %v45_v12 = vcvt.s32.f32 %v43_v11  ;;  %v44_v18 = vcvt.s32.f32 %v42_v15 }
  0x9a   :  { %46 = vmin.xlane.f32.xlu0 %v45_v12 }
  0xa1   :  { %v92_v13 = vpop.eup %91 }
  0xa2   :  { %v25_v14 = vsel %vm18_vm0, %v92_v13, 0.0 }
  0xa3   :  { %26 = vadd.xlane.f32.xlu1 %v25_v14 }
 0x127   :  { %v47_v17 = vpop.xlane.xlu0 %46 }
 0x128   :  { %vm48_vm3 = vcmp.eq.f32.partialorder %v45_v12, %v47_v17  ;;  %v53_v23 = vcvt.f32.s32 %v47_v17 }
 0x129   :  { %v49_v19 = vsel %vm48_vm3, %v44_v18, inf }
 0x12a   :  { %50 = vmin.xlane.f32.xlu0 %v49_v19  ;;  %v54_v27 = vshll.u32 %v53_v23, 16 }
 0x12e   :  { %34 = vadd.xlane.f32.xlu0 %v33_v21 }
 0x130   :  { %v27_v22 = vpop.xlane.xlu1 %26 }
 0x131   :  { %93 = vlog2.f32 %v27_v22 }
 0x13b   :  { %v94_v25 = vpop.eup %93 }
 0x13c   :  { %v37_v31 = vmul.f32 0.6931472, %v94_v25 }
 0x1b7   :  { %v51_v26 = vpop.xlane.xlu0 %50 }
 0x1b8   :  { %v52_v28 = vcvt.f32.s32 %v51_v26 }
 0x1ba   :  { %v55_v30 = vadd.s32 %v54_v27, %v52_v28 }
 0x1bb   :  { %v35_v32 = vpop.xlane.xlu0 %34 }
 0x1bc   :  { %v38_v33 = vsub.f32 %v37_v31, %v35_v32  ;;  %v67_v34 = vrot.slane %v55_v30, %v59_v29 }
 0x1be   :  { %v60_v35 = vrot.slane %v38_v33, %v59_v29  ;;  %68 = vst.msk [vmem:[#allocation2] sm:$0x1] %vm62_vm4, %v67_v34 }
 0x1bf   :  { %106 = shalt.err (!%p103_p4)
}
 0x1c0   :  { %s107_s20 = scalar_lea.hbm %s171_s3, 16 }
 0x1c1   :  { %p108_p5 = scmp.ne.s32.totalorder %s171_s3, %s107_s20  ;;  %p111_p6 = scmp.lt.u32.totalorder %s107_s20, %s171_s3 }
 0x1c3   :  { %p113_p7 = pnand %p111_p6, %p108_p5 }
 0x1c5   :  { %116 = shalt.err (!%p113_p7)
}
 0x1c6   :  { %80 = dma.vmem_to_hbm [thread:$0]  %s78_s1, 16, %s171_s3, [#allocation3]   ;;  %63 = vst.msk [vmem:[%s170_s2] sm:$0x1] %vm62_vm4, %v60_v35 }
 0x1c7   :  { %117 = dma.done.wait [#allocation3], 16  }
 0x1c8   :  { %118 = vsyncadd [#allocation3], 4294967280 }
 0x1c9   :  { %86 = vsyncpa [#allocation3], 1 }

</bundles_post_ra>
